<compile_context>
chip_gen: v6e
topology: v6e:2x2x1
jax: 0.10.0
libtpu: 0.0.40
codegen_flags: <defaults>
</compile_context>

<pallas_src>
import functools
import math

import jax
import jax.numpy as jnp
from jax.experimental import pallas as pl
from jax.experimental.pallas import tpu as pltpu


def _label_smoothing_kernel(logp_ref, target_ref, neg_one_hot_ref, out_ref, *,
                            neg_confidence, smoothing_value,
                            log_smoothing_value, const_term, ignore_indices):
    # Load (and widen if the input is bf16 -- cast is a free VPU op under DMA).
    logp = logp_ref[...].astype(jnp.float32)        # (tn, V) log-probs
    tgt = target_ref[...]                           # (tn, 1) int32
    neg_oh = neg_one_hot_ref[...]                   # (1, V): -sv, 0 at ignored

    _, V = logp.shape
    cols = jax.lax.broadcasted_iota(jnp.int32, (1, V), 1)
    is_tgt = cols == tgt                            # (tn, V) via broadcast

    # Per-element weight of logp in the loss:
    #   -confidence at the target column, -one_hot_v elsewhere.
    w = jnp.where(is_tgt, jnp.float32(neg_confidence), neg_oh)   # (tn, V)
    weighted = jnp.sum(logp * w, axis=-1, keepdims=True)         # (tn, 1)

    # Row-dependent constant: C0 - one_hot[target] * log(smoothing_value).
    # one_hot[target] is 0 iff target is one of the (static) ignore indices.
    if ignore_indices:
        tgt_is_ign = functools.reduce(
            jnp.logical_or, [tgt == idx for idx in ignore_indices])
        oh_t = jnp.where(tgt_is_ign, 0.0, smoothing_value)       # (tn, 1)
        row_const = const_term - oh_t * log_smoothing_value
    else:
        row_const = const_term - smoothing_value * log_smoothing_value

    # TODO(synk): output is a (tile_n, 1) column (masked vst); it is <1/V of
    # the traffic here, so the lane-dense-output transpose was not worth it.
    out_ref[...] = row_const + weighted


class LabelSmoothingPallas:
    """JAX/Pallas equivalent of the PyTorch LabelSmoothing module."""

    def __init__(self, smoothing, tgt_vocab_size, ignore_indices=None):
        if ignore_indices is None:
            ignore_indices = []
        self.tgt_vocab_size = int(tgt_vocab_size)
        self.ignore_indices = tuple(int(i) for i in ignore_indices)
        n_ign = len(self.ignore_indices)

        sv = smoothing / float(tgt_vocab_size - 1 - n_ign)
        conf = 1.0 - float(smoothing)
        self.smoothing_value = float(sv)
        self.confidence = float(conf)
        # Guard the degenerate cases (smoothing == 0 or == 1): x*log(x) -> 0.
        self.log_sv = math.log(sv) if sv > 0.0 else 0.0
        log_conf = math.log(conf) if conf > 0.0 else 0.0
        # C0 = (V - n_ign) * sv * log(sv) + confidence * log(confidence)
        self.const_term = ((tgt_vocab_size - n_ign) * sv * self.log_sv
                           + conf * log_conf)

        one_hot = jnp.full((tgt_vocab_size,), sv, dtype=jnp.float32)
        for idx in self.ignore_indices:
            one_hot = one_hot.at[idx].set(0.0)
        self.one_hot = one_hot.reshape(1, tgt_vocab_size)     # (1, V) for ref
        self.neg_one_hot = -self.one_hot                      # kernel input

    def __call__(self, model_prob, target):
        # model_prob: [..., V] log-probs (f32 or bf16); target: [...] ints.
        orig_lead = model_prob.shape[:-1]
        V = model_prob.shape[-1]
        assert V == self.tgt_vocab_size

        logp = model_prob.reshape(-1, V)                # keep dtype: no upcast
        tgt = target.reshape(-1, 1).astype(jnp.int32)   # (N, 1)
        N = logp.shape[0]

        # Pick the largest row tile that keeps a double-buffered input block
        # comfortably inside VMEM on every generation (<= ~12 MiB per block,
        # <= ~24 MiB buffered; safe on v7x's 64 MiB physical VMEM).
        itemsize = jnp.dtype(logp.dtype).itemsize
        row_bytes = V * itemsize
        budget = 12 * 1024 * 1024
        tile_n = max(8, min(1024, budget // max(row_bytes, 1)))
        tile_n = max(8, (tile_n // 8) * 8)
        if N > 8:
            # Keep the grid length >= 2 so both v7x TensorCores get work.
            half = (((N + 1) // 2) + 7) // 8 * 8
            tile_n = max(8, min(tile_n, half))
        grid_n = pl.cdiv(N, tile_n)     # no jnp.pad: partial blocks are masked

        kernel = functools.partial(
            _label_smoothing_kernel,
            neg_confidence=-self.confidence,
            smoothing_value=self.smoothing_value,
            log_smoothing_value=self.log_sv,
            const_term=self.const_term,
            ignore_indices=self.ignore_indices,
        )

        cost = pl.CostEstimate(
            flops=2 * N * V,
            transcendentals=0,
            bytes_accessed=N * row_bytes + N * 4 + N * 4 + V * 4,
        )

        out = pl.pallas_call(
            kernel,
            out_shape=jax.ShapeDtypeStruct((N, 1), jnp.float32),
            grid=(grid_n,),
            in_specs=[
                pl.BlockSpec((tile_n, V), lambda i: (i, 0)),   # log-prob rows
                pl.BlockSpec((tile_n, 1), lambda i: (i, 0)),   # targets
                pl.BlockSpec((1, V), lambda i: (0, 0)),        # -one_hot row
            ],
            out_specs=pl.BlockSpec((tile_n, 1), lambda i: (i, 0)),
            compiler_params=pltpu.CompilerParams(
                dimension_semantics=("parallel",),
                vmem_limit_bytes=48 * 1024 * 1024,
            ),
            cost_estimate=cost,
        )(logp, tgt, self.neg_one_hot)

        return out[:, 0].reshape(orig_lead)


def _reference(model_prob, target, one_hot, confidence):
    # Pure-JAX reference of the PyTorch forward (for verification only).
    V = model_prob.shape[-1]
    logp = model_prob.reshape(-1, V).astype(jnp.float32)
    tgt = target.reshape(-1, 1)
    cols = jnp.arange(V)[None, :]
    true_dist = jnp.broadcast_to(one_hot, logp.shape)
    true_dist = jnp.where(cols == tgt, confidence, true_dist)
    pos = true_dist > 0
    safe_t = jnp.where(pos, true_dist, 1.0)
    contrib = jnp.where(pos, true_dist * (jnp.log(safe_t) - logp), 0.0)
    return contrib.sum(-1).reshape(model_prob.shape[:-1])


if __name__ == "__main__":
    B, T, V = 2, 8, 128
    smoothing = 0.1
    ignore_indices = [0]

    key = jax.random.PRNGKey(0)
    k1, k2 = jax.random.split(key)
    logits = jax.random.normal(k1, (B, T, V), dtype=jnp.float32)
    model_prob = jax.nn.log_softmax(logits, axis=-1)          # log-probs
    target = jax.random.randint(k2, (B, T), 1, V, dtype=jnp.int32)
    # Exercise the "target is an ignore index" edge case too.
    target = target.at[0, 0].set(0)

    module = LabelSmoothingPallas(smoothing, V, ignore_indices)
    out = jax.block_until_ready(module(model_prob, target))
    ref = _reference(model_prob, target, module.one_hot, module.confidence)
    assert out.shape == (B, T)
    assert jnp.allclose(out, ref, atol=1e-4, rtol=1e-4)

    # Second shape: N not a multiple of the row tile (exercises partial/masked
    # blocks — no jnp.pad of the big array anywhere).
    B2, T2 = 2, 5
    logits2 = jax.random.normal(k1, (B2, T2, V), dtype=jnp.float32)
    model_prob2 = jax.nn.log_softmax(logits2, axis=-1)
    target2 = jax.random.randint(k2, (B2, T2), 0, V, dtype=jnp.int32)
    out2 = jax.block_until_ready(module(model_prob2, target2))
    ref2 = _reference(model_prob2, target2, module.one_hot, module.confidence)
    assert out2.shape == (B2, T2)
    assert jnp.allclose(out2, ref2, atol=1e-4, rtol=1e-4)

    print("KERNEL_OK")
</pallas_src>

<mosaic_0001>
module attributes {stable_mosaic.version = 11 : i64} {
  func.func @_label_smoothing_kernel(%arg0: i32, %arg1: memref<8x128xf32, #tpu.memory_space<vmem>>, %arg2: memref<8x1xi32, #tpu.memory_space<vmem>>, %arg3: memref<1x128xf32, #tpu.memory_space<vmem>>, %arg4: memref<8x1xf32, #tpu.memory_space<vmem>>) attributes {dimension_semantics = [#tpu.dimension_semantics<parallel>], iteration_bounds = array<i64: 2>, scalar_prefetch = 0 : i64, scratch_operands = 0 : i64, tpu.core_type = #tpu.core_type<tc>, window_params = [{transform_indices = @transform_0, window_bounds = array<i64: 8, 128>}, {transform_indices = @transform_1, window_bounds = array<i64: 8, 1>}, {pipeline_mode = #tpu.pipeline_mode<synchronous>, transform_indices = @transform_2, window_bounds = array<i64: 1, 128>}, {transform_indices = @transform_3, window_bounds = array<i64: 8, 1>}]} {
    %c0 = arith.constant 0 : index
    %c0_0 = arith.constant 0 : index
    %0 = vector.load %arg1[%c0, %c0_0] : memref<8x128xf32, #tpu.memory_space<vmem>>, vector<8x128xf32>
    %c0_1 = arith.constant 0 : index
    %c0_2 = arith.constant 0 : index
    %1 = vector.load %arg2[%c0_1, %c0_2] : memref<8x1xi32, #tpu.memory_space<vmem>>, vector<8x1xi32>
    %c0_3 = arith.constant 0 : index
    %c0_4 = arith.constant 0 : index
    %2 = vector.load %arg3[%c0_3, %c0_4] : memref<1x128xf32, #tpu.memory_space<vmem>>, vector<1x128xf32>
    %3 = tpu.iota {dimensions = array<i32: 1>} : vector<1x128xi32>
    %4 = vector.broadcast %3 : vector<1x128xi32> to vector<8x128xi32>
    %5 = vector.broadcast %1 : vector<8x1xi32> to vector<8x128xi32>
    %6 = arith.cmpi eq, %4, %5 : vector<8x128xi32>
    %cst = arith.constant -0.899999976 : f32
    %7 = vector.broadcast %cst : f32 to vector<8x128xf32>
    %8 = vector.shape_cast %2 : vector<1x128xf32> to vector<1x128xf32>
    %9 = vector.broadcast %8 : vector<1x128xf32> to vector<8x128xf32>
    %10 = arith.select %6, %7, %9 : vector<8x128xi1>, vector<8x128xf32>
    %11 = arith.mulf %0, %10 : vector<8x128xf32>
    %cst_5 = arith.constant dense<0.000000e+00> : vector<8xf32>
    %12 = vector.multi_reduction <add>, %11, %cst_5 [1] : vector<8x128xf32> to vector<8xf32>
    %13 = vector.shape_cast %12 : vector<8xf32> to vector<8x1xf32>
    %c0_i32 = arith.constant 0 : i32
    %14 = vector.broadcast %c0_i32 : i32 to vector<8x1xi32>
    %15 = arith.cmpi eq, %1, %14 : vector<8x1xi32>
    %cst_6 = arith.constant 0.000000e+00 : f32
    %cst_7 = arith.constant 7.93650805E-4 : f32
    %16 = vector.broadcast %cst_6 : f32 to vector<8x1xf32>
    %17 = vector.broadcast %cst_7 : f32 to vector<8x1xf32>
    %18 = arith.select %15, %16, %17 : vector<8x1xi1>, vector<8x1xf32>
    %cst_8 = arith.constant -7.1388669 : f32
    %19 = vector.broadcast %cst_8 : f32 to vector<8x1xf32>
    %20 = arith.mulf %18, %19 : vector<8x1xf32>
    %cst_9 = arith.constant -0.81437695 : f32
    %21 = vector.broadcast %cst_9 : f32 to vector<8x1xf32>
    %22 = arith.subf %21, %20 : vector<8x1xf32>
    %23 = arith.addf %22, %13 : vector<8x1xf32>
    %c0_10 = arith.constant 0 : index
    %c0_11 = arith.constant 0 : index
    %24 = vector.load %arg4[%c0_10, %c0_11] : memref<8x1xf32, #tpu.memory_space<vmem>>, vector<8x1xf32>
    tpu.vector_store %arg4[%c0_10, %c0_11], %23 {strides = array<i32>} : memref<8x1xf32, #tpu.memory_space<vmem>>, vector<8x1xf32>,
    return
  }
  func.func @transform_0(%arg0: i32) -> (i32, i32) {
    %c0_i32 = arith.constant 0 : i32
    %c0_i32_0 = arith.constant 0 : i32
    return %arg0, %c0_i32 : i32, i32
  }
  func.func @transform_1(%arg0: i32) -> (i32, i32) {
    %c0_i32 = arith.constant 0 : i32
    %c0_i32_0 = arith.constant 0 : i32
    return %arg0, %c0_i32 : i32, i32
  }
  func.func @transform_2(%arg0: i32) -> (i32, i32) {
    %c0_i32 = arith.constant 0 : i32
    %c0_i32_0 = arith.constant 0 : i32
    %c0_i32_1 = arith.constant 0 : i32
    return %c0_i32, %c0_i32_0 : i32, i32
  }
  func.func @transform_3(%arg0: i32) -> (i32, i32) {
    %c0_i32 = arith.constant 0 : i32
    %c0_i32_0 = arith.constant 0 : i32
    return %arg0, %c0_i32 : i32, i32
  }
}

</mosaic_0001>

<bundles_post_ra>
// kernel: tpu_custom_call.1
= control target key start
LH: loop header
LB: loop body
LE: loop exit
PB: predicated region body
PF: predicated region fallthrough
CT: control target
= control target key end

     0   :  { %s326_s12 = smov 0   ;;  %s349_s0 = inlined_call_operand.vmem [shape: f32[16,128], index: 0, kind: input, shape index: {}]   ;;  %s350_s1 = inlined_call_operand.vmem [shape: s32[16,1], index: 1, kind: input, shape index: {}]   ;;  %s351_s2 = inlined_call_operand.vmem [shape: f32[1,128], index: 2, kind: input, shape index: {}]   ;;  %s352_s3 = inlined_call_operand.vmem [shape: f32[16,1], index: 3, kind: output, shape index: {}]  }
   0x1 LB: > { %s274_s13 = sadd.s32 4294967295, %s302_s12   ;;  %p278_p0 = scmp.ge.s32.totalorder %s302_s12, 1  ;;  %s302_s12 = sphi %s326_s12, %s13_s12  }
   0x2   : > { %p145_p1 = scmp.lt.s32.totalorder %s302_s12, 3 }
   0x4   : > { %p146_p2 = pnand %p278_p0, %p145_p1 }
   0x5   : > { %p171_p3 = scmp.lt.s32.totalorder (!%p146_p2), %s274_s13, 1 }
   0x6   : > { %149 = sbr.rel (%p146_p2) target bundleno = 284 (0x11c), region = 32 }
   0xb   : > { %v304_v0 = vmov 0   ;;  %s354_s13 = smov (!%p171_p3, %s274_s13), 1  ;;  %v186_v2 = vlaneseq  ;;  %v282_v4 = vld [vmem:[%s351_s2] ss:$0 sm:$0xff]  ;;  %v305_v9 = vmov 0.0007936508  }
   0xc   : > { %295 = vset.pattern.permute.xlu0 %v304_v0  ;;  %s279_s14 = sshll.u32 %s354_s13, 3  ;;  %vm207_vm2 = vcmask 7168  }
   0xd   : > { %s178_s17 = scalar_lea.vmem %s350_s1, %s279_s14  ;;  %v187_v3 = vand.u32 127, %v186_v2  ;;  %s174_s20 = scalar_lea.vmem %s349_s0, %s279_s14 }
   0xe   : > { %v184_v1 = vld [vmem:[%s178_s17] sm:$0xff]  ;;  %s182_s25 = scalar_lea.vmem %s352_s3, %s279_s14 }
   0xf   : > { %189 = vperm.xlu0 %295, %v184_v1   ;;  %v183_v6 = vld [vmem:[%s174_s20] sm:$0xff]  ;;  %vm202_vm1 = vcmp.eq.s32.totalorder %v184_v1, 0 }
  0x10   : > { %v203_v10 = vsel %vm202_vm1, 0.0, %v305_v9 }
  0x11   : > { %v204_v11 = vmul.f32 -7.138867, %v203_v10 }
  0x13   : > { %v205_v12 = vsub.f32 -0.81437695, %v204_v11 }
  0x8a   : > { %v190_v5 = vpop.permute.xlu0 %189 }
  0x8b   : > { %vm191_vm0 = vcmp.eq.s32.totalorder %v187_v3, %v190_v5 }
  0x8c   : > { %v198_v7 = vsel %vm191_vm0, -0.9, %v282_v4 }
  0x8d   : > { %v199_v8 = vmul.f32 %v198_v7, %v183_v6 }
  0x8f   : > { %200 = vadd.xlane.f32.xlu0 %v199_v8 }
 0x118   : > { %v201_v13 = vpop.xlane.xlu0 %200 }
 0x119   : > { %v206_v14 = vadd.f32 %v205_v12, %v201_v13 }
 0x11b   : > { %208 = vst.msk [vmem:[%s182_s25] sm:$0xff] %vm207_vm2, %v206_v14 }
 0x11c PF: > { %s13_s12 = sadd.s32 1, %s302_s12  }
 0x11d   : > { %p10_p4 = scmp.ge.s32.totalorder %s13_s12, 4  }
 0x11f   :  { %12 = sbr.rel (!%p10_p4) target bundleno = 1 (0x1), region = 65 }

</bundles_post_ra>
